<compile_context>
chip_gen: v5e
topology: v5e:2x2
jax: 0.10.0
libtpu: 0.0.40
codegen_flags: <defaults>
</compile_context>

<pallas_src>
import functools

import jax
import jax.numpy as jnp
from jax.experimental import pallas as pl
from jax.experimental.pallas import tpu as pltpu

# Layer sizes (match the PyTorch module: 4 -> 8 -> 4 -> 1).
IN, H1, H2, OUT = 4, 8, 4, 1

# Offsets into the packed parameter vector (PyTorch (out, in) weights, row-major).
W1_OFF = 0
B1_OFF = W1_OFF + H1 * IN          # 32
W2_OFF = B1_OFF + H1               # 40
B2_OFF = W2_OFF + H2 * H1          # 72
W3_OFF = B2_OFF + H2               # 76
B3_OFF = W3_OFF + OUT * H2         # 80
N_PARAMS = B3_OFF + OUT            # 81


def _mlp_kernel(p_ref, x_ref, o_ref):
    """p_ref: (81,) f32 in SMEM; x_ref: (4, TB) f32; o_ref: (1, TB) f32."""
    x = x_ref[...]                               # (IN, TB), batch on lanes
    xr = [x[k:k + 1, :] for k in range(IN)]      # IN rows of (1, TB)

    # fc1 + ReLU: h1[j] = relu(sum_k w1[j, k] * x[k] + b1[j])   -- 32 FMAs
    h1 = []
    for j in range(H1):
        acc = xr[0] * p_ref[W1_OFF + j * IN]
        for k in range(1, IN):
            acc = acc + xr[k] * p_ref[W1_OFF + j * IN + k]
        h1.append(jnp.maximum(acc + p_ref[B1_OFF + j], 0.0))

    # fc2 + ReLU                                                  -- 32 FMAs
    h2 = []
    for i in range(H2):
        acc = h1[0] * p_ref[W2_OFF + i * H1]
        for j in range(1, H1):
            acc = acc + h1[j] * p_ref[W2_OFF + i * H1 + j]
        h2.append(jnp.maximum(acc + p_ref[B2_OFF + i], 0.0))

    # fc3 + Sigmoid                                               -- 4 FMAs
    z = h2[0] * p_ref[W3_OFF]
    for i in range(1, H2):
        z = z + h2[i] * p_ref[W3_OFF + i]
    z = z + p_ref[B3_OFF]
    o_ref[...] = jax.nn.sigmoid(z)               # (1, TB), lane-dense store


def pack_params(params):
    """Pack PyTorch-convention (out, in) weights + biases into one flat f32 vector."""
    w1, b1, w2, b2, w3, b3 = params
    packed = jnp.concatenate([
        w1.reshape(-1), b1.reshape(-1),
        w2.reshape(-1), b2.reshape(-1),
        w3.reshape(-1), b3.reshape(-1),
    ]).astype(jnp.float32)
    assert packed.shape == (N_PARAMS,)
    return packed


def _round_up(n, m):
    return ((n + m - 1) // m) * m


@functools.partial(jax.jit, static_argnames=("tb",))
def risk_classifier_forward(x, packed, *, tb=512):
    """x: (B, 4) float32 -> (B, 1) float32 (sigmoid risk score)."""
    B = x.shape[0]
    # Lane-aligned batch tile; don't over-pad tiny batches.
    tb_eff = min(tb, _round_up(B, 128))
    b_pad = _round_up(B, tb_eff)

    # Batch on lanes: (B, 4) -> (4, B_pad), zero-padded along lanes.
    xt = jnp.pad(x.T, ((0, 0), (0, b_pad - B)))

    grid_spec = pltpu.PrefetchScalarGridSpec(
        num_scalar_prefetch=1,                        # packed params -> SMEM
        grid=(b_pad // tb_eff,),
        in_specs=[pl.BlockSpec((IN, tb_eff), lambda i, p: (0, i))],
        out_specs=pl.BlockSpec((OUT, tb_eff), lambda i, p: (0, i)),
    )
    out = pl.pallas_call(
        _mlp_kernel,
        out_shape=jax.ShapeDtypeStruct((OUT, b_pad), jnp.float32),
        grid_spec=grid_spec,
        compiler_params=pltpu.CompilerParams(
            dimension_semantics=("parallel",),        # megacore / 2-TC split on v7x
        ),
    )(packed, xt)

    return out[:, :B].T                               # back to (B, 1)


def init_params(key):
    """PyTorch nn.Linear default init: U[-1/sqrt(fan_in), +1/sqrt(fan_in)], (out, in) weights."""
    def linear(key, fan_in, fan_out):
        kw, kb = jax.random.split(key)
        bound = 1.0 / jnp.sqrt(fan_in)
        w = jax.random.uniform(kw, (fan_out, fan_in), jnp.float32, -bound, bound)
        b = jax.random.uniform(kb, (fan_out,), jnp.float32, -bound, bound)
        return w, b

    k1, k2, k3 = jax.random.split(key, 3)
    w1, b1 = linear(k1, IN, H1)
    w2, b2 = linear(k2, H1, H2)
    w3, b3 = linear(k3, H2, OUT)
    return (w1, b1, w2, b2, w3, b3)


def reference_forward(x, params):
    """Pure-JAX reference matching the PyTorch module."""
    w1, b1, w2, b2, w3, b3 = params
    h = jnp.maximum(x @ w1.T + b1, 0.0)
    h = jnp.maximum(h @ w2.T + b2, 0.0)
    return jax.nn.sigmoid(h @ w3.T + b3)


if __name__ == "__main__":
    key = jax.random.PRNGKey(0)
    k_params, k_x1, k_x2 = jax.random.split(key, 3)

    params = init_params(k_params)
    packed = pack_params(params)

    # Small batch consistent with the module (8 samples, 4 risk features).
    x_small = jax.random.normal(k_x1, (8, IN), jnp.float32)
    out_small = jax.block_until_ready(risk_classifier_forward(x_small, packed))
    ref_small = reference_forward(x_small, params)
    assert out_small.shape == (8, 1)
    assert jnp.allclose(out_small, ref_small, atol=1e-5), "mismatch vs reference (B=8)"

    # Non-multiple-of-128 batch exercises lane padding + a multi-step parallel grid.
    x_big = jax.random.normal(k_x2, (300, IN), jnp.float32)
    out_big = jax.block_until_ready(risk_classifier_forward(x_big, packed, tb=128))
    ref_big = reference_forward(x_big, params)
    assert out_big.shape == (300, 1)
    assert jnp.allclose(out_big, ref_big, atol=1e-5), "mismatch vs reference (B=300)"

    print("KERNEL_OK")
</pallas_src>

<mosaic_0001>
module attributes {stable_mosaic.version = 11 : i64} {
  func.func @_mlp_kernel(%arg0: i32, %arg1: memref<81xf32, #tpu.memory_space<smem>>, %arg2: memref<4x128xf32, #tpu.memory_space<vmem>>, %arg3: memref<1x128xf32, #tpu.memory_space<vmem>>) attributes {dimension_semantics = [#tpu.dimension_semantics<parallel>], iteration_bounds = array<i64: 1>, scalar_prefetch = 1 : i64, scratch_operands = 0 : i64, tpu.core_type = #tpu.core_type<tc>, window_params = [{transform_indices = @transform_0, window_bounds = array<i64: 4, 128>}, {transform_indices = @transform_1, window_bounds = array<i64: 1, 128>}]} {
    %c0 = arith.constant 0 : index
    %c0_0 = arith.constant 0 : index
    %0 = vector.load %arg2[%c0, %c0_0] : memref<4x128xf32, #tpu.memory_space<vmem>>, vector<4x128xf32>
    %1 = vector.extract_strided_slice %0 {offsets = [0, 0], sizes = [1, 128], strides = [1, 1]} : vector<4x128xf32> to vector<1x128xf32>
    %2 = vector.extract_strided_slice %0 {offsets = [1, 0], sizes = [1, 128], strides = [1, 1]} : vector<4x128xf32> to vector<1x128xf32>
    %3 = vector.extract_strided_slice %0 {offsets = [2, 0], sizes = [1, 128], strides = [1, 1]} : vector<4x128xf32> to vector<1x128xf32>
    %4 = vector.extract_strided_slice %0 {offsets = [3, 0], sizes = [1, 128], strides = [1, 1]} : vector<4x128xf32> to vector<1x128xf32>
    %c0_1 = arith.constant 0 : index
    %5 = memref.load %arg1[%c0_1] : memref<81xf32, #tpu.memory_space<smem>>
    %6 = vector.broadcast %5 : f32 to vector<1x128xf32>
    %7 = arith.mulf %1, %6 : vector<1x128xf32>
    %c1 = arith.constant 1 : index
    %8 = memref.load %arg1[%c1] : memref<81xf32, #tpu.memory_space<smem>>
    %9 = vector.broadcast %8 : f32 to vector<1x128xf32>
    %10 = arith.mulf %2, %9 : vector<1x128xf32>
    %11 = arith.addf %7, %10 : vector<1x128xf32>
    %c2 = arith.constant 2 : index
    %12 = memref.load %arg1[%c2] : memref<81xf32, #tpu.memory_space<smem>>
    %13 = vector.broadcast %12 : f32 to vector<1x128xf32>
    %14 = arith.mulf %3, %13 : vector<1x128xf32>
    %15 = arith.addf %11, %14 : vector<1x128xf32>
    %c3 = arith.constant 3 : index
    %16 = memref.load %arg1[%c3] : memref<81xf32, #tpu.memory_space<smem>>
    %17 = vector.broadcast %16 : f32 to vector<1x128xf32>
    %18 = arith.mulf %4, %17 : vector<1x128xf32>
    %19 = arith.addf %15, %18 : vector<1x128xf32>
    %c32 = arith.constant 32 : index
    %20 = memref.load %arg1[%c32] : memref<81xf32, #tpu.memory_space<smem>>
    %21 = vector.broadcast %20 : f32 to vector<1x128xf32>
    %22 = arith.addf %19, %21 : vector<1x128xf32>
    %cst = arith.constant 0.000000e+00 : f32
    %23 = vector.broadcast %cst : f32 to vector<1x128xf32>
    %24 = arith.maximumf %22, %23 : vector<1x128xf32>
    %c4 = arith.constant 4 : index
    %25 = memref.load %arg1[%c4] : memref<81xf32, #tpu.memory_space<smem>>
    %26 = vector.broadcast %25 : f32 to vector<1x128xf32>
    %27 = arith.mulf %1, %26 : vector<1x128xf32>
    %c5 = arith.constant 5 : index
    %28 = memref.load %arg1[%c5] : memref<81xf32, #tpu.memory_space<smem>>
    %29 = vector.broadcast %28 : f32 to vector<1x128xf32>
    %30 = arith.mulf %2, %29 : vector<1x128xf32>
    %31 = arith.addf %27, %30 : vector<1x128xf32>
    %c6 = arith.constant 6 : index
    %32 = memref.load %arg1[%c6] : memref<81xf32, #tpu.memory_space<smem>>
    %33 = vector.broadcast %32 : f32 to vector<1x128xf32>
    %34 = arith.mulf %3, %33 : vector<1x128xf32>
    %35 = arith.addf %31, %34 : vector<1x128xf32>
    %c7 = arith.constant 7 : index
    %36 = memref.load %arg1[%c7] : memref<81xf32, #tpu.memory_space<smem>>
    %37 = vector.broadcast %36 : f32 to vector<1x128xf32>
    %38 = arith.mulf %4, %37 : vector<1x128xf32>
    %39 = arith.addf %35, %38 : vector<1x128xf32>
    %c33 = arith.constant 33 : index
    %40 = memref.load %arg1[%c33] : memref<81xf32, #tpu.memory_space<smem>>
    %41 = vector.broadcast %40 : f32 to vector<1x128xf32>
    %42 = arith.addf %39, %41 : vector<1x128xf32>
    %cst_2 = arith.constant 0.000000e+00 : f32
    %43 = vector.broadcast %cst_2 : f32 to vector<1x128xf32>
    %44 = arith.maximumf %42, %43 : vector<1x128xf32>
    %c8 = arith.constant 8 : index
    %45 = memref.load %arg1[%c8] : memref<81xf32, #tpu.memory_space<smem>>
    %46 = vector.broadcast %45 : f32 to vector<1x128xf32>
    %47 = arith.mulf %1, %46 : vector<1x128xf32>
    %c9 = arith.constant 9 : index
    %48 = memref.load %arg1[%c9] : memref<81xf32, #tpu.memory_space<smem>>
    %49 = vector.broadcast %48 : f32 to vector<1x128xf32>
    %50 = arith.mulf %2, %49 : vector<1x128xf32>
    %51 = arith.addf %47, %50 : vector<1x128xf32>
    %c10 = arith.constant 10 : index
    %52 = memref.load %arg1[%c10] : memref<81xf32, #tpu.memory_space<smem>>
    %53 = vector.broadcast %52 : f32 to vector<1x128xf32>
    %54 = arith.mulf %3, %53 : vector<1x128xf32>
    %55 = arith.addf %51, %54 : vector<1x128xf32>
    %c11 = arith.constant 11 : index
    %56 = memref.load %arg1[%c11] : memref<81xf32, #tpu.memory_space<smem>>
    %57 = vector.broadcast %56 : f32 to vector<1x128xf32>
    %58 = arith.mulf %4, %57 : vector<1x128xf32>
    %59 = arith.addf %55, %58 : vector<1x128xf32>
    %c34 = arith.constant 34 : index
    %60 = memref.load %arg1[%c34] : memref<81xf32, #tpu.memory_space<smem>>
    %61 = vector.broadcast %60 : f32 to vector<1x128xf32>
    %62 = arith.addf %59, %61 : vector<1x128xf32>
    %cst_3 = arith.constant 0.000000e+00 : f32
    %63 = vector.broadcast %cst_3 : f32 to vector<1x128xf32>
    %64 = arith.maximumf %62, %63 : vector<1x128xf32>
    %c12 = arith.constant 12 : index
    %65 = memref.load %arg1[%c12] : memref<81xf32, #tpu.memory_space<smem>>
    %66 = vector.broadcast %65 : f32 to vector<1x128xf32>
    %67 = arith.mulf %1, %66 : vector<1x128xf32>
    %c13 = arith.constant 13 : index
    %68 = memref.load %arg1[%c13] : memref<81xf32, #tpu.memory_space<smem>>
    %69 = vector.broadcast %68 : f32 to vector<1x128xf32>
    %70 = arith.mulf %2, %69 : vector<1x128xf32>
    %71 = arith.addf %67, %70 : vector<1x128xf32>
    %c14 = arith.constant 14 : index
    %72 = memref.load %arg1[%c14] : memref<81xf32, #tpu.memory_space<smem>>
    %73 = vector.broadcast %72 : f32 to vector<1x128xf32>
    %74 = arith.mulf %3, %73 : vector<1x128xf32>
    %75 = arith.addf %71, %74 : vector<1x128xf32>
    %c15 = arith.constant 15 : index
    %76 = memref.load %arg1[%c15] : memref<81xf32, #tpu.memory_space<smem>>
    %77 = vector.broadcast %76 : f32 to vector<1x128xf32>
    %78 = arith.mulf %4, %77 : vector<1x128xf32>
    %79 = arith.addf %75, %78 : vector<1x128xf32>
    %c35 = arith.constant 35 : index
    %80 = memref.load %arg1[%c35] : memref<81xf32, #tpu.memory_space<smem>>
    %81 = vector.broadcast %80 : f32 to vector<1x128xf32>
    %82 = arith.addf %79, %81 : vector<1x128xf32>
    %cst_4 = arith.constant 0.000000e+00 : f32
    %83 = vector.broadcast %cst_4 : f32 to vector<1x128xf32>
    %84 = arith.maximumf %82, %83 : vector<1x128xf32>
    %c16 = arith.constant 16 : index
    %85 = memref.load %arg1[%c16] : memref<81xf32, #tpu.memory_space<smem>>
    %86 = vector.broadcast %85 : f32 to vector<1x128xf32>
    %87 = arith.mulf %1, %86 : vector<1x128xf32>
    %c17 = arith.constant 17 : index
    %88 = memref.load %arg1[%c17] : memref<81xf32, #tpu.memory_space<smem>>
    %89 = vector.broadcast %88 : f32 to vector<1x128xf32>
    %90 = arith.mulf %2, %89 : vector<1x128xf32>
    %91 = arith.addf %87, %90 : vector<1x128xf32>
    %c18 = arith.constant 18 : index
    %92 = memref.load %arg1[%c18] : memref<81xf32, #tpu.memory_space<smem>>
    %93 = vector.broadcast %92 : f32 to vector<1x128xf32>
    %94 = arith.mulf %3, %93 : vector<1x128xf32>
    %95 = arith.addf %91, %94 : vector<1x128xf32>
    %c19 = arith.constant 19 : index
    %96 = memref.load %arg1[%c19] : memref<81xf32, #tpu.memory_space<smem>>
    %97 = vector.broadcast %96 : f32 to vector<1x128xf32>
    %98 = arith.mulf %4, %97 : vector<1x128xf32>
    %99 = arith.addf %95, %98 : vector<1x128xf32>
    %c36 = arith.constant 36 : index
    %100 = memref.load %arg1[%c36] : memref<81xf32, #tpu.memory_space<smem>>
    %101 = vector.broadcast %100 : f32 to vector<1x128xf32>
    %102 = arith.addf %99, %101 : vector<1x128xf32>
    %cst_5 = arith.constant 0.000000e+00 : f32
    %103 = vector.broadcast %cst_5 : f32 to vector<1x128xf32>
    %104 = arith.maximumf %102, %103 : vector<1x128xf32>
    %c20 = arith.constant 20 : index
    %105 = memref.load %arg1[%c20] : memref<81xf32, #tpu.memory_space<smem>>
    %106 = vector.broadcast %105 : f32 to vector<1x128xf32>
    %107 = arith.mulf %1, %106 : vector<1x128xf32>
    %c21 = arith.constant 21 : index
    %108 = memref.load %arg1[%c21] : memref<81xf32, #tpu.memory_space<smem>>
    %109 = vector.broadcast %108 : f32 to vector<1x128xf32>
    %110 = arith.mulf %2, %109 : vector<1x128xf32>
    %111 = arith.addf %107, %110 : vector<1x128xf32>
    %c22 = arith.constant 22 : index
    %112 = memref.load %arg1[%c22] : memref<81xf32, #tpu.memory_space<smem>>
    %113 = vector.broadcast %112 : f32 to vector<1x128xf32>
    %114 = arith.mulf %3, %113 : vector<1x128xf32>
    %115 = arith.addf %111, %114 : vector<1x128xf32>
    %c23 = arith.constant 23 : index
    %116 = memref.load %arg1[%c23] : memref<81xf32, #tpu.memory_space<smem>>
    %117 = vector.broadcast %116 : f32 to vector<1x128xf32>
    %118 = arith.mulf %4, %117 : vector<1x128xf32>
    %119 = arith.addf %115, %118 : vector<1x128xf32>
    %c37 = arith.constant 37 : index
    %120 = memref.load %arg1[%c37] : memref<81xf32, #tpu.memory_space<smem>>
    %121 = vector.broadcast %120 : f32 to vector<1x128xf32>
    %122 = arith.addf %119, %121 : vector<1x128xf32>
    %cst_6 = arith.constant 0.000000e+00 : f32
    %123 = vector.broadcast %cst_6 : f32 to vector<1x128xf32>
    %124 = arith.maximumf %122, %123 : vector<1x128xf32>
    %c24 = arith.constant 24 : index
    %125 = memref.load %arg1[%c24] : memref<81xf32, #tpu.memory_space<smem>>
    %126 = vector.broadcast %125 : f32 to vector<1x128xf32>
    %127 = arith.mulf %1, %126 : vector<1x128xf32>
    %c25 = arith.constant 25 : index
    %128 = memref.load %arg1[%c25] : memref<81xf32, #tpu.memory_space<smem>>
    %129 = vector.broadcast %128 : f32 to vector<1x128xf32>
    %130 = arith.mulf %2, %129 : vector<1x128xf32>
    %131 = arith.addf %127, %130 : vector<1x128xf32>
    %c26 = arith.constant 26 : index
    %132 = memref.load %arg1[%c26] : memref<81xf32, #tpu.memory_space<smem>>
    %133 = vector.broadcast %132 : f32 to vector<1x128xf32>
    %134 = arith.mulf %3, %133 : vector<1x128xf32>
    %135 = arith.addf %131, %134 : vector<1x128xf32>
    %c27 = arith.constant 27 : index
    %136 = memref.load %arg1[%c27] : memref<81xf32, #tpu.memory_space<smem>>
    %137 = vector.broadcast %136 : f32 to vector<1x128xf32>
    %138 = arith.mulf %4, %137 : vector<1x128xf32>
    %139 = arith.addf %135, %138 : vector<1x128xf32>
    %c38 = arith.constant 38 : index
    %140 = memref.load %arg1[%c38] : memref<81xf32, #tpu.memory_space<smem>>
    %141 = vector.broadcast %140 : f32 to vector<1x128xf32>
    %142 = arith.addf %139, %141 : vector<1x128xf32>
    %cst_7 = arith.constant 0.000000e+00 : f32
    %143 = vector.broadcast %cst_7 : f32 to vector<1x128xf32>
    %144 = arith.maximumf %142, %143 : vector<1x128xf32>
    %c28 = arith.constant 28 : index
    %145 = memref.load %arg1[%c28] : memref<81xf32, #tpu.memory_space<smem>>
    %146 = vector.broadcast %145 : f32 to vector<1x128xf32>
    %147 = arith.mulf %1, %146 : vector<1x128xf32>
    %c29 = arith.constant 29 : index
    %148 = memref.load %arg1[%c29] : memref<81xf32, #tpu.memory_space<smem>>
    %149 = vector.broadcast %148 : f32 to vector<1x128xf32>
    %150 = arith.mulf %2, %149 : vector<1x128xf32>
    %151 = arith.addf %147, %150 : vector<1x128xf32>
    %c30 = arith.constant 30 : index
    %152 = memref.load %arg1[%c30] : memref<81xf32, #tpu.memory_space<smem>>
    %153 = vector.broadcast %152 : f32 to vector<1x128xf32>
    %154 = arith.mulf %3, %153 : vector<1x128xf32>
    %155 = arith.addf %151, %154 : vector<1x128xf32>
    %c31 = arith.constant 31 : index
    %156 = memref.load %arg1[%c31] : memref<81xf32, #tpu.memory_space<smem>>
    %157 = vector.broadcast %156 : f32 to vector<1x128xf32>
    %158 = arith.mulf %4, %157 : vector<1x128xf32>
    %159 = arith.addf %155, %158 : vector<1x128xf32>
    %c39 = arith.constant 39 : index
    %160 = memref.load %arg1[%c39] : memref<81xf32, #tpu.memory_space<smem>>
    %161 = vector.broadcast %160 : f32 to vector<1x128xf32>
    %162 = arith.addf %159, %161 : vector<1x128xf32>
    %cst_8 = arith.constant 0.000000e+00 : f32
    %163 = vector.broadcast %cst_8 : f32 to vector<1x128xf32>
    %164 = arith.maximumf %162, %163 : vector<1x128xf32>
    %c40 = arith.constant 40 : index
    %165 = memref.load %arg1[%c40] : memref<81xf32, #tpu.memory_space<smem>>
    %166 = vector.broadcast %165 : f32 to vector<1x128xf32>
    %167 = arith.mulf %24, %166 : vector<1x128xf32>
    %c41 = arith.constant 41 : index
    %168 = memref.load %arg1[%c41] : memref<81xf32, #tpu.memory_space<smem>>
    %169 = vector.broadcast %168 : f32 to vector<1x128xf32>
    %170 = arith.mulf %44, %169 : vector<1x128xf32>
    %171 = arith.addf %167, %170 : vector<1x128xf32>
    %c42 = arith.constant 42 : index
    %172 = memref.load %arg1[%c42] : memref<81xf32, #tpu.memory_space<smem>>
    %173 = vector.broadcast %172 : f32 to vector<1x128xf32>
    %174 = arith.mulf %64, %173 : vector<1x128xf32>
    %175 = arith.addf %171, %174 : vector<1x128xf32>
    %c43 = arith.constant 43 : index
    %176 = memref.load %arg1[%c43] : memref<81xf32, #tpu.memory_space<smem>>
    %177 = vector.broadcast %176 : f32 to vector<1x128xf32>
    %178 = arith.mulf %84, %177 : vector<1x128xf32>
    %179 = arith.addf %175, %178 : vector<1x128xf32>
    %c44 = arith.constant 44 : index
    %180 = memref.load %arg1[%c44] : memref<81xf32, #tpu.memory_space<smem>>
    %181 = vector.broadcast %180 : f32 to vector<1x128xf32>
    %182 = arith.mulf %104, %181 : vector<1x128xf32>
    %183 = arith.addf %179, %182 : vector<1x128xf32>
    %c45 = arith.constant 45 : index
    %184 = memref.load %arg1[%c45] : memref<81xf32, #tpu.memory_space<smem>>
    %185 = vector.broadcast %184 : f32 to vector<1x128xf32>
    %186 = arith.mulf %124, %185 : vector<1x128xf32>
    %187 = arith.addf %183, %186 : vector<1x128xf32>
    %c46 = arith.constant 46 : index
    %188 = memref.load %arg1[%c46] : memref<81xf32, #tpu.memory_space<smem>>
    %189 = vector.broadcast %188 : f32 to vector<1x128xf32>
    %190 = arith.mulf %144, %189 : vector<1x128xf32>
    %191 = arith.addf %187, %190 : vector<1x128xf32>
    %c47 = arith.constant 47 : index
    %192 = memref.load %arg1[%c47] : memref<81xf32, #tpu.memory_space<smem>>
    %193 = vector.broadcast %192 : f32 to vector<1x128xf32>
    %194 = arith.mulf %164, %193 : vector<1x128xf32>
    %195 = arith.addf %191, %194 : vector<1x128xf32>
    %c72 = arith.constant 72 : index
    %196 = memref.load %arg1[%c72] : memref<81xf32, #tpu.memory_space<smem>>
    %197 = vector.broadcast %196 : f32 to vector<1x128xf32>
    %198 = arith.addf %195, %197 : vector<1x128xf32>
    %cst_9 = arith.constant 0.000000e+00 : f32
    %199 = vector.broadcast %cst_9 : f32 to vector<1x128xf32>
    %200 = arith.maximumf %198, %199 : vector<1x128xf32>
    %c48 = arith.constant 48 : index
    %201 = memref.load %arg1[%c48] : memref<81xf32, #tpu.memory_space<smem>>
    %202 = vector.broadcast %201 : f32 to vector<1x128xf32>
    %203 = arith.mulf %24, %202 : vector<1x128xf32>
    %c49 = arith.constant 49 : index
    %204 = memref.load %arg1[%c49] : memref<81xf32, #tpu.memory_space<smem>>
    %205 = vector.broadcast %204 : f32 to vector<1x128xf32>
    %206 = arith.mulf %44, %205 : vector<1x128xf32>
    %207 = arith.addf %203, %206 : vector<1x128xf32>
    %c50 = arith.constant 50 : index
    %208 = memref.load %arg1[%c50] : memref<81xf32, #tpu.memory_space<smem>>
    %209 = vector.broadcast %208 : f32 to vector<1x128xf32>
    %210 = arith.mulf %64, %209 : vector<1x128xf32>
    %211 = arith.addf %207, %210 : vector<1x128xf32>
    %c51 = arith.constant 51 : index
    %212 = memref.load %arg1[%c51] : memref<81xf32, #tpu.memory_space<smem>>
    %213 = vector.broadcast %212 : f32 to vector<1x128xf32>
    %214 = arith.mulf %84, %213 : vector<1x128xf32>
    %215 = arith.addf %211, %214 : vector<1x128xf32>
    %c52 = arith.constant 52 : index
    %216 = memref.load %arg1[%c52] : memref<81xf32, #tpu.memory_space<smem>>
    %217 = vector.broadcast %216 : f32 to vector<1x128xf32>
    %218 = arith.mulf %104, %217 : vector<1x128xf32>
    %219 = arith.addf %215, %218 : vector<1x128xf32>
    %c53 = arith.constant 53 : index
    %220 = memref.load %arg1[%c53] : memref<81xf32, #tpu.memory_space<smem>>
    %221 = vector.broadcast %220 : f32 to vector<1x128xf32>
    %222 = arith.mulf %124, %221 : vector<1x128xf32>
    %223 = arith.addf %219, %222 : vector<1x128xf32>
    %c54 = arith.constant 54 : index
    %224 = memref.load %arg1[%c54] : memref<81xf32, #tpu.memory_space<smem>>
    %225 = vector.broadcast %224 : f32 to vector<1x128xf32>
    %226 = arith.mulf %144, %225 : vector<1x128xf32>
    %227 = arith.addf %223, %226 : vector<1x128xf32>
    %c55 = arith.constant 55 : index
    %228 = memref.load %arg1[%c55] : memref<81xf32, #tpu.memory_space<smem>>
    %229 = vector.broadcast %228 : f32 to vector<1x128xf32>
    %230 = arith.mulf %164, %229 : vector<1x128xf32>
    %231 = arith.addf %227, %230 : vector<1x128xf32>
    %c73 = arith.constant 73 : index
    %232 = memref.load %arg1[%c73] : memref<81xf32, #tpu.memory_space<smem>>
    %233 = vector.broadcast %232 : f32 to vector<1x128xf32>
    %234 = arith.addf %231, %233 : vector<1x128xf32>
    %cst_10 = arith.constant 0.000000e+00 : f32
    %235 = vector.broadcast %cst_10 : f32 to vector<1x128xf32>
    %236 = arith.maximumf %234, %235 : vector<1x128xf32>
    %c56 = arith.constant 56 : index
    %237 = memref.load %arg1[%c56] : memref<81xf32, #tpu.memory_space<smem>>
    %238 = vector.broadcast %237 : f32 to vector<1x128xf32>
    %239 = arith.mulf %24, %238 : vector<1x128xf32>
    %c57 = arith.constant 57 : index
    %240 = memref.load %arg1[%c57] : memref<81xf32, #tpu.memory_space<smem>>
    %241 = vector.broadcast %240 : f32 to vector<1x128xf32>
    %242 = arith.mulf %44, %241 : vector<1x128xf32>
    %243 = arith.addf %239, %242 : vector<1x128xf32>
    %c58 = arith.constant 58 : index
    %244 = memref.load %arg1[%c58] : memref<81xf32, #tpu.memory_space<smem>>
    %245 = vector.broadcast %244 : f32 to vector<1x128xf32>
    %246 = arith.mulf %64, %245 : vector<1x128xf32>
    %247 = arith.addf %243, %246 : vector<1x128xf32>
    %c59 = arith.constant 59 : index
    %248 = memref.load %arg1[%c59] : memref<81xf32, #tpu.memory_space<smem>>
    %249 = vector.broadcast %248 : f32 to vector<1x128xf32>
    %250 = arith.mulf %84, %249 : vector<1x128xf32>
    %251 = arith.addf %247, %250 : vector<1x128xf32>
    %c60 = arith.constant 60 : index
    %252 = memref.load %arg1[%c60] : memref<81xf32, #tpu.memory_space<smem>>
    %253 = vector.broadcast %252 : f32 to vector<1x128xf32>
    %254 = arith.mulf %104, %253 : vector<1x128xf32>
    %255 = arith.addf %251, %254 : vector<1x128xf32>
    %c61 = arith.constant 61 : index
    %256 = memref.load %arg1[%c61] : memref<81xf32, #tpu.memory_space<smem>>
    %257 = vector.broadcast %256 : f32 to vector<1x128xf32>
    %258 = arith.mulf %124, %257 : vector<1x128xf32>
    %259 = arith.addf %255, %258 : vector<1x128xf32>
    %c62 = arith.constant 62 : index
    %260 = memref.load %arg1[%c62] : memref<81xf32, #tpu.memory_space<smem>>
    %261 = vector.broadcast %260 : f32 to vector<1x128xf32>
    %262 = arith.mulf %144, %261 : vector<1x128xf32>
    %263 = arith.addf %259, %262 : vector<1x128xf32>
    %c63 = arith.constant 63 : index
    %264 = memref.load %arg1[%c63] : memref<81xf32, #tpu.memory_space<smem>>
    %265 = vector.broadcast %264 : f32 to vector<1x128xf32>
    %266 = arith.mulf %164, %265 : vector<1x128xf32>
    %267 = arith.addf %263, %266 : vector<1x128xf32>
    %c74 = arith.constant 74 : index
    %268 = memref.load %arg1[%c74] : memref<81xf32, #tpu.memory_space<smem>>
    %269 = vector.broadcast %268 : f32 to vector<1x128xf32>
    %270 = arith.addf %267, %269 : vector<1x128xf32>
    %cst_11 = arith.constant 0.000000e+00 : f32
    %271 = vector.broadcast %cst_11 : f32 to vector<1x128xf32>
    %272 = arith.maximumf %270, %271 : vector<1x128xf32>
    %c64 = arith.constant 64 : index
    %273 = memref.load %arg1[%c64] : memref<81xf32, #tpu.memory_space<smem>>
    %274 = vector.broadcast %273 : f32 to vector<1x128xf32>
    %275 = arith.mulf %24, %274 : vector<1x128xf32>
    %c65 = arith.constant 65 : index
    %276 = memref.load %arg1[%c65] : memref<81xf32, #tpu.memory_space<smem>>
    %277 = vector.broadcast %276 : f32 to vector<1x128xf32>
    %278 = arith.mulf %44, %277 : vector<1x128xf32>
    %279 = arith.addf %275, %278 : vector<1x128xf32>
    %c66 = arith.constant 66 : index
    %280 = memref.load %arg1[%c66] : memref<81xf32, #tpu.memory_space<smem>>
    %281 = vector.broadcast %280 : f32 to vector<1x128xf32>
    %282 = arith.mulf %64, %281 : vector<1x128xf32>
    %283 = arith.addf %279, %282 : vector<1x128xf32>
    %c67 = arith.constant 67 : index
    %284 = memref.load %arg1[%c67] : memref<81xf32, #tpu.memory_space<smem>>
    %285 = vector.broadcast %284 : f32 to vector<1x128xf32>
    %286 = arith.mulf %84, %285 : vector<1x128xf32>
    %287 = arith.addf %283, %286 : vector<1x128xf32>
    %c68 = arith.constant 68 : index
    %288 = memref.load %arg1[%c68] : memref<81xf32, #tpu.memory_space<smem>>
    %289 = vector.broadcast %288 : f32 to vector<1x128xf32>
    %290 = arith.mulf %104, %289 : vector<1x128xf32>
    %291 = arith.addf %287, %290 : vector<1x128xf32>
    %c69 = arith.constant 69 : index
    %292 = memref.load %arg1[%c69] : memref<81xf32, #tpu.memory_space<smem>>
    %293 = vector.broadcast %292 : f32 to vector<1x128xf32>
    %294 = arith.mulf %124, %293 : vector<1x128xf32>
    %295 = arith.addf %291, %294 : vector<1x128xf32>
    %c70 = arith.constant 70 : index
    %296 = memref.load %arg1[%c70] : memref<81xf32, #tpu.memory_space<smem>>
    %297 = vector.broadcast %296 : f32 to vector<1x128xf32>
    %298 = arith.mulf %144, %297 : vector<1x128xf32>
    %299 = arith.addf %295, %298 : vector<1x128xf32>
    %c71 = arith.constant 71 : index
    %300 = memref.load %arg1[%c71] : memref<81xf32, #tpu.memory_space<smem>>
    %301 = vector.broadcast %300 : f32 to vector<1x128xf32>
    %302 = arith.mulf %164, %301 : vector<1x128xf32>
    %303 = arith.addf %299, %302 : vector<1x128xf32>
    %c75 = arith.constant 75 : index
    %304 = memref.load %arg1[%c75] : memref<81xf32, #tpu.memory_space<smem>>
    %305 = vector.broadcast %304 : f32 to vector<1x128xf32>
    %306 = arith.addf %303, %305 : vector<1x128xf32>
    %cst_12 = arith.constant 0.000000e+00 : f32
    %307 = vector.broadcast %cst_12 : f32 to vector<1x128xf32>
    %308 = arith.maximumf %306, %307 : vector<1x128xf32>
    %c76 = arith.constant 76 : index
    %309 = memref.load %arg1[%c76] : memref<81xf32, #tpu.memory_space<smem>>
    %310 = vector.broadcast %309 : f32 to vector<1x128xf32>
    %311 = arith.mulf %200, %310 : vector<1x128xf32>
    %c77 = arith.constant 77 : index
    %312 = memref.load %arg1[%c77] : memref<81xf32, #tpu.memory_space<smem>>
    %313 = vector.broadcast %312 : f32 to vector<1x128xf32>
    %314 = arith.mulf %236, %313 : vector<1x128xf32>
    %315 = arith.addf %311, %314 : vector<1x128xf32>
    %c78 = arith.constant 78 : index
    %316 = memref.load %arg1[%c78] : memref<81xf32, #tpu.memory_space<smem>>
    %317 = vector.broadcast %316 : f32 to vector<1x128xf32>
    %318 = arith.mulf %272, %317 : vector<1x128xf32>
    %319 = arith.addf %315, %318 : vector<1x128xf32>
    %c79 = arith.constant 79 : index
    %320 = memref.load %arg1[%c79] : memref<81xf32, #tpu.memory_space<smem>>
    %321 = vector.broadcast %320 : f32 to vector<1x128xf32>
    %322 = arith.mulf %308, %321 : vector<1x128xf32>
    %323 = arith.addf %319, %322 : vector<1x128xf32>
    %c80 = arith.constant 80 : index
    %324 = memref.load %arg1[%c80] : memref<81xf32, #tpu.memory_space<smem>>
    %325 = vector.broadcast %324 : f32 to vector<1x128xf32>
    %326 = arith.addf %323, %325 : vector<1x128xf32>
    %327 = arith.negf %326 : vector<1x128xf32>
    %328 = math.exp %327 : vector<1x128xf32>
    %cst_13 = arith.constant 1.000000e+00 : f32
    %329 = vector.broadcast %cst_13 : f32 to vector<1x128xf32>
    %330 = arith.addf %329, %328 : vector<1x128xf32>
    %331 = arith.divf %329, %330 : vector<1x128xf32>
    %c0_14 = arith.constant 0 : index
    %c0_15 = arith.constant 0 : index
    %332 = vector.load %arg3[%c0_14, %c0_15] : memref<1x128xf32, #tpu.memory_space<vmem>>, vector<1x128xf32>
    tpu.vector_store %arg3[%c0_14, %c0_15], %331 {strides = array<i32>} : memref<1x128xf32, #tpu.memory_space<vmem>>, vector<1x128xf32>,
    return
  }
  func.func @transform_0(%arg0: i32, %arg1: memref<81xf32, #tpu.memory_space<smem>>) -> (i32, i32) {
    %c0_i32 = arith.constant 0 : i32
    %c0_i32_0 = arith.constant 0 : i32
    return %c0_i32, %arg0 : i32, i32
  }
  func.func @transform_1(%arg0: i32, %arg1: memref<81xf32, #tpu.memory_space<smem>>) -> (i32, i32) {
    %c0_i32 = arith.constant 0 : i32
    %c0_i32_0 = arith.constant 0 : i32
    return %c0_i32, %arg0 : i32, i32
  }
}

</mosaic_0001>

<bundles_post_ra>
// kernel: risk_classifier_forward.1
= control target key start
LH: loop header
LB: loop body
LE: loop exit
PB: predicated region body
PF: predicated region fallthrough
CT: control target
= control target key end

     0   :  { %s524_s12 = smov [#allocation3]   ;;  %s787_s0 = inlined_call_operand.vmem [shape: f32[81], index: 0, kind: input, shape index: {}]   ;;  %s788_s1 = inlined_call_operand.vmem [shape: f32[4,128], index: 1, kind: input, shape index: {}]   ;;  %s789_s2 = inlined_call_operand.vmem [shape: f32[1,128], index: 2, kind: output, shape index: {}]  }
   0x1   :  { %s8_s11 = sshll.u32 %s787_s0, 4  ;;  %s9_s11 = int_to_ptr.vmem [resolvable:$true] %s8_s11 }
   0x2   :  { %11 = dma.vmem_to_smem %s9_s11, 16, %s524_s12, [#allocation2] }
   0x3   :  { %522 = dma.done.wait [#allocation2], 16 }
   0x4   :  { %523 = vsyncadd [#allocation2], 4294967280 }
   0x5   :  { %14 = sfence }
   0x6   :  { %s18_s13 = sld [smem:[#allocation3]]  ;;  %v552_v0 = vld [vmem:[%s788_s1] sm:$0xf] }
   0x7   :  { %s424_s14 = sld [smem:[#allocation3 + $0x1]] }
   0x8   :  { %s425_s15 = sld [smem:[#allocation3 + $0x2]] }
   0x9   :  { %s543_s16 = sld [smem:[#allocation3 + $0x3]] }
   0xa   :  { %s545_s17 = sld [smem:[#allocation3 + $0x20]] }
   0xb   :  { %s428_s18 = sld [smem:[#allocation3 + $0x4]] }
   0xc   :  { %s429_s19 = sld [smem:[#allocation3 + $0x5]]  ;;  %v19_v4 = vstv %s18_s13 }
   0xd   :  { %s430_s20 = sld [smem:[#allocation3 + $0x6]]  ;;  %v22_v1 = vstv %s424_s14  ;;  %v20_v9 = vmul.f32 %v19_v4, %v552_v0 }
   0xe   :  { %s547_s21 = sld [smem:[#allocation3 + $0x7]]  ;;  %v23_v2 = vmul.f32 %v22_v1, %v552_v0  ;;  %v29_v5 = vstv %s425_s15 }
   0xf   :  { %s554_s23 = sld [smem:[#allocation3 + $0x21]]  ;;  %v30_v11 = vmul.f32 %v29_v5, %v552_v0  ;;  %v36_v12 = vstv %s543_s16 }
  0x10   :  { %s556_s24 = sld [smem:[#allocation3 + $0x8]]  ;;  %v25_v10 = vrot.slane %v23_v2, 1  ;;  %v37_v23 = vmul.f32 %v36_v12, %v552_v0  ;;  %v43_v54 = vstv %s545_s17 }
  0x11   :  { %s434_s25 = sld [smem:[#allocation3 + $0x9]]  ;;  %v47_v7 = vstv %s428_s18  ;;  %v32_v22 = vrot.slane %v30_v11, 2 }
  0x12   :  { %v50_v3 = vstv %s429_s19  ;;  %s559_s26 = sld [smem:[#allocation3 + $0xa]]  ;;  %v48_v13 = vmul.f32 %v47_v7, %v552_v0  ;;  %v27_v21 = vadd.f32 %v25_v10, %v20_v9  ;;  %v39_v39 = vrot.slane %v37_v23, 3 }
  0x13   :  { %v51_v6 = vmul.f32 %v50_v3, %v552_v0  ;;  %s562_s27 = sld [smem:[#allocation3 + $0xb]]  ;;  %v57_v8 = vstv %s430_s20 }
  0x14   :  { %s564_s1 = sld [smem:[#allocation3 + $0x22]]  ;;  %v58_v15 = vmul.f32 %v57_v8, %v552_v0  ;;  %v64_v17 = vstv %s547_s21  ;;  %v34_v38 = vadd.f32 %v32_v22, %v27_v21 }
  0x15   :  { %s566_s28 = sld [smem:[#allocation3 + $0xc]]  ;;  %v53_v14 = vrot.slane %v51_v6, 1  ;;  %v65_v26 = vmul.f32 %v64_v17, %v552_v0  ;;  %v71_v56 = vstv %s554_s23 }
  0x16   :  { %s439_s29 = sld [smem:[#allocation3 + $0xd]]  ;;  %v75_v19 = vstv %s556_s24  ;;  %v60_v25 = vrot.slane %v58_v15, 2  ;;  %v41_v53 = vadd.f32 %v39_v39, %v34_v38 }
  0x17   :  { %v78_v16 = vstv %s434_s25  ;;  %s440_s30 = sld [smem:[#allocation3 + $0xe]]  ;;  %v55_v24 = vadd.f32 %v53_v14, %v48_v13  ;;  %v76_v28 = vmul.f32 %v75_v19, %v552_v0  ;;  %v67_v40 = vrot.slane %v65_v26, 3 }
  0x18   :  { %v79_v18 = vmul.f32 %v78_v16, %v552_v0  ;;  %s575_s3 = sld [smem:[#allocation3 + $0xf]]  ;;  %v85_v20 = vstv %s559_s26  ;;  %v44_v4 = vadd.f32 %v43_v54, %v41_v53 }
  0x19   :  { %s579_s4 = sld [smem:[#allocation3 + $0x23]]  ;;  %v86_v30 = vmul.f32 %v85_v20, %v552_v0  ;;  %v92_v32 = vstv %s562_s27  ;;  %v62_v42 = vadd.f32 %v60_v25, %v55_v24 }
  0x1a   :  { %s582_s5 = sld [smem:[#allocation3 + $0x10]]  ;;  %v81_v29 = vrot.slane %v79_v18, 1  ;;  %v93_v45 = vmul.f32 %v92_v32, %v552_v0  ;;  %v99_v9 = vstv %s564_s1  ;;  %v657_v32 = vmax.f32 %v44_v4, 0.0 }
  0x1b   :  { %v103_v27 = vstv %s566_s28  ;;  %s586_s6 = sld [smem:[#allocation3 + $0x11]]  ;;  %v88_v44 = vrot.slane %v86_v30, 2  ;;  %v69_v55 = vadd.f32 %v67_v40, %v62_v42 }
  0x1c   :  { %v106_v31 = vstv %s439_s29  ;;  %s590_s7 = sld [smem:[#allocation3 + $0x12]]  ;;  %v104_v35 = vmul.f32 %v103_v27, %v552_v0  ;;  %v83_v43 = vadd.f32 %v81_v29, %v76_v28  ;;  %v95_v58 = vrot.slane %v93_v45, 3 }
  0x1d   :  { %v107_v33 = vmul.f32 %v106_v31, %v552_v0  ;;  %v113_v34 = vstv %s440_s30  ;;  %s594_s8 = sld [smem:[#allocation3 + $0x13]]  ;;  %v72_v16 = vadd.f32 %v71_v56, %v69_v55 }
  0x1e   :  { %v114_v36 = vmul.f32 %v113_v34, %v552_v0  ;;  %v120_v37 = vstv %s575_s3  ;;  %s599_s9 = sld [smem:[#allocation3 + $0x24]]  ;;  %v90_v57 = vadd.f32 %v88_v44, %v83_v43 }
  0x1f   :  { %v109_v41 = vrot.slane %v107_v33, 1  ;;  %s601_s10 = sld [smem:[#allocation3 + $0x14]]  ;;  %v121_v47 = vmul.f32 %v120_v37, %v552_v0  ;;  %v127_v20 = vstv %s579_s4  ;;  %v665_v40 = vmax.f32 %v72_v16, 0.0 }
  0x20   :  { %s449_s11 = sld [smem:[#allocation3 + $0x15]]  ;;  %v116_v46 = vrot.slane %v114_v36, 2  ;;  %v131_v50 = vstv %s582_s5  ;;  %v97_v8 = vadd.f32 %v95_v58, %v90_v57 }
  0x21   :  { %v134_v48 = vstv %s586_s6  ;;  %s606_s12 = sld [smem:[#allocation3 + $0x16]]  ;;  %v111_v49 = vadd.f32 %v109_v41, %v104_v35  ;;  %v132_v59 = vmul.f32 %v131_v50, %v552_v0  ;;  %v123_v1 = vrot.slane %v121_v47, 3 }
  0x22   :  { %v135_v51 = vmul.f32 %v134_v48, %v552_v0  ;;  %v141_v52 = vstv %s590_s7  ;;  %s611_s13 = sld [smem:[#allocation3 + $0x17]]  ;;  %v100_v24 = vadd.f32 %v99_v9, %v97_v8 }
  0x23   :  { %s614_s14 = sld [smem:[#allocation3 + $0x25]]  ;;  %v142_v61 = vmul.f32 %v141_v52, %v552_v0  ;;  %v118_v63 = vadd.f32 %v116_v46, %v111_v49  ;;  %v148_v2 = vstv %s594_s8 }
  0x24   :  { %s617_s15 = sld [smem:[#allocation3 + $0x18]]  ;;  %v137_v60 = vrot.slane %v135_v51, 1  ;;  %v149_v14 = vmul.f32 %v148_v2, %v552_v0  ;;  %v667_v41 = vmax.f32 %v100_v24, 0.0  ;;  %v155_v49 = vstv %s599_s9 }
  0x25   :  { %v159_v62 = vstv %s601_s10  ;;  %s622_s16 = sld [smem:[#allocation3 + $0x19]]  ;;  %v144_v13 = vrot.slane %v142_v61, 2  ;;  %v125_v17 = vadd.f32 %v123_v1, %v118_v63 }
  0x26   :  { %v162_v3 = vstv %s449_s11  ;;  %s625_s17 = sld [smem:[#allocation3 + $0x1a]]  ;;  %v160_v5 = vmul.f32 %v159_v62, %v552_v0  ;;  %v139_v12 = vadd.f32 %v137_v60, %v132_v59  ;;  %v151_v29 = vrot.slane %v149_v14, 3 }
  0x27   :  { %v163_v6 = vmul.f32 %v162_v3, %v552_v0  ;;  %v169_v7 = vstv %s606_s12  ;;  %s630_s18 = sld [smem:[#allocation3 + $0x1b]]  ;;  %v128_v33 = vadd.f32 %v127_v20, %v125_v17 }
  0x28   :  { %v170_v10 = vmul.f32 %v169_v7, %v552_v0  ;;  %v176_v11 = vstv %s611_s13  ;;  %s635_s19 = sld [smem:[#allocation3 + $0x26]]  ;;  %v146_v28 = vadd.f32 %v144_v13, %v139_v12 }
  0x29   :  { %v165_v15 = vrot.slane %v163_v6, 1  ;;  %s638_s20 = sld [smem:[#allocation3 + $0x1c]]  ;;  %v177_v18 = vmul.f32 %v176_v11, %v552_v0  ;;  %v677_v48 = vmax.f32 %v128_v33, 0.0  ;;  %v183_v56 = vstv %s614_s14 }
  0x2a   :  { %v187_v19 = vstv %s617_s15  ;;  %s642_s21 = sld [smem:[#allocation3 + $0x1d]]  ;;  %v172_v22 = vrot.slane %v170_v10, 2  ;;  %v153_v44 = vadd.f32 %v151_v29, %v146_v28 }
  0x2b   :  { %v167_v21 = vadd.f32 %v165_v15, %v160_v5  ;;  %v190_v23 = vstv %s622_s16  ;;  %s646_s22 = sld [smem:[#allocation3 + $0x1e]]  ;;  %v188_v25 = vmul.f32 %v187_v19, %v552_v0  ;;  %v179_v34 = vrot.slane %v177_v18, 3 }
  0x2c   :  { %v191_v26 = vmul.f32 %v190_v23, %v552_v0  ;;  %v197_v27 = vstv %s625_s17  ;;  %s651_s0 = sld [smem:[#allocation3 + $0x1f]]  ;;  %v156_v60 = vadd.f32 %v155_v49, %v153_v44 }
  0x2d   :  { %v198_v30 = vmul.f32 %v197_v27, %v552_v0  ;;  %v204_v31 = vstv %s630_s18  ;;  %s655_s23 = sld [smem:[#allocation3 + $0x27]]  ;;  %v174_v36 = vadd.f32 %v172_v22, %v167_v21 }
  0x2e   :  { %v193_v35 = vrot.slane %v191_v26, 1  ;;  %s659_s24 = sld [smem:[#allocation3 + $0x28]]  ;;  %v205_v38 = vmul.f32 %v204_v31, %v552_v0  ;;  %v211_v6 = vstv %s635_s19  ;;  %v702_v10 = vmax.f32 %v156_v60, 0.0 }
  0x2f   :  { %v200_v37 = vrot.slane %v198_v30, 2  ;;  %v215_v39 = vstv %s638_s20  ;;  %s663_s25 = sld [smem:[#allocation3 + $0x29]]  ;;  %v181_v52 = vadd.f32 %v179_v34, %v174_v36 }
  0x30   :  { %v195_v42 = vadd.f32 %v193_v35, %v188_v25  ;;  %v218_v43 = vstv %s642_s21  ;;  %s670_s26 = sld [smem:[#allocation3 + $0x2a]]  ;;  %v216_v45 = vmul.f32 %v215_v39, %v552_v0  ;;  %v207_v54 = vrot.slane %v205_v38, 3 }
  0x31   :  { %v219_v46 = vmul.f32 %v218_v43, %v552_v0  ;;  %v225_v47 = vstv %s646_s22  ;;  %s675_s27 = sld [smem:[#allocation3 + $0x2b]]  ;;  %v184_v3 = vadd.f32 %v183_v56, %v181_v52 }
  0x32   :  { %v226_v50 = vmul.f32 %v225_v47, %v552_v0  ;;  %v232_v51 = vstv %s651_s0  ;;  %s682_s1 = sld [smem:[#allocation3 + $0x2c]]  ;;  %v202_v53 = vadd.f32 %v200_v37, %v195_v42 }
  0x33   :  { %v221_v55 = vrot.slane %v219_v46, 1  ;;  %s684_s28 = sld [smem:[#allocation3 + $0x2d]]  ;;  %v233_v58 = vmul.f32 %v232_v51, %v552_v0  ;;  %v706_v14 = vmax.f32 %v184_v3, 0.0  ;;  %v239_v18 = vstv %s655_s23 }
  0x34   :  { %v228_v57 = vrot.slane %v226_v50, 2  ;;  %v243_v59 = vstv %s659_s24  ;;  %s689_s29 = sld [smem:[#allocation3 + $0x2e]]  ;;  %v209_v4 = vadd.f32 %v207_v54, %v202_v53 }
  0x35   :  { %v223_v61 = vadd.f32 %v221_v55, %v216_v45  ;;  %v244_v62 = vmul.f32 %v243_v59, %v657_v32  ;;  %v246_v63 = vstv %s663_s25  ;;  %s693_s30 = sld [smem:[#allocation3 + $0x2f]]  ;;  %v235_v8 = vrot.slane %v233_v58, 3 }
  0x36   :  { %v247_v1 = vmul.f32 %v246_v63, %v665_v40  ;;  %v250_v2 = vstv %s670_s26  ;;  %s697_s3 = sld [smem:[#allocation3 + $0x48]]  ;;  %v212_v15 = vadd.f32 %v211_v6, %v209_v4 }
  0x37   :  { %v251_v0 = vmul.f32 %v250_v2, %v667_v41  ;;  %v254_v5 = vstv %s675_s27  ;;  %s472_s4 = sld [smem:[#allocation3 + $0x30]]  ;;  %v230_v7 = vadd.f32 %v228_v57, %v223_v61 }
  0x38   :  { %v248_v9 = vadd.f32 %v247_v1, %v244_v62  ;;  %s473_s5 = sld [smem:[#allocation3 + $0x31]]  ;;  %v255_v11 = vmul.f32 %v254_v5, %v677_v48  ;;  %v258_v13 = vstv %s682_s1  ;;  %v718_v24 = vmax.f32 %v212_v15, 0.0 }
  0x39   :  { %s474_s6 = sld [smem:[#allocation3 + $0x32]]  ;;  %v237_v16 = vadd.f32 %v235_v8, %v230_v7  ;;  %v262_v17 = vstv %s684_s28  ;;  %v259_v20 = vmul.f32 %v258_v13, %v702_v10 }
  0x3a   :  { %v252_v12 = vadd.f32 %v251_v0, %v248_v9  ;;  %s475_s7 = sld [smem:[#allocation3 + $0x33]]  ;;  %v263_v25 = vmul.f32 %v262_v17, %v706_v14  ;;  %v266_v29 = vstv %s689_s29 }
  0x3b   :  { %s476_s8 = sld [smem:[#allocation3 + $0x34]]  ;;  %v240_v28 = vadd.f32 %v239_v18, %v237_v16  ;;  %v267_v43 = vmul.f32 %v266_v29, %v718_v24  ;;  %v270_v46 = vstv %s693_s30 }
  0x3c   :  { %s709_s9 = sld [smem:[#allocation3 + $0x35]]  ;;  %v256_v19 = vadd.f32 %v255_v11, %v252_v12  ;;  %v274_v9 = vstv %s697_s3 }
  0x3d   :  { %v278_v21 = vstv %s472_s4  ;;  %s713_s10 = sld [smem:[#allocation3 + $0x36]]  ;;  %v729_v42 = vmax.f32 %v240_v28, 0.0 }
  0x3e   :  { %v279_v22 = vmul.f32 %v278_v21, %v657_v32  ;;  %v281_v23 = vstv %s473_s5  ;;  %s716_s11 = sld [smem:[#allocation3 + $0x37]]  ;;  %v260_v33 = vadd.f32 %v259_v20, %v256_v19 }
  0x3f   :  { %v282_v26 = vmul.f32 %v281_v23, %v665_v40  ;;  %v285_v27 = vstv %s474_s6  ;;  %s722_s12 = sld [smem:[#allocation3 + $0x49]]  ;;  %v271_v55 = vmul.f32 %v270_v46, %v729_v42 }
  0x40   :  { %v286_v30 = vmul.f32 %v285_v27, %v667_v41  ;;  %v289_v31 = vstv %s475_s7  ;;  %s481_s13 = sld [smem:[#allocation3 + $0x38]]  ;;  %v264_v45 = vadd.f32 %v263_v25, %v260_v33 }
  0x41   :  { %v283_v34 = vadd.f32 %v282_v26, %v279_v22  ;;  %v290_v35 = vmul.f32 %v289_v31, %v677_v48  ;;  %v293_v36 = vstv %s476_s8  ;;  %s482_s14 = sld [smem:[#allocation3 + $0x39]] }
  0x42   :  { %v297_v37 = vstv %s709_s9  ;;  %s483_s15 = sld [smem:[#allocation3 + $0x3a]]  ;;  %v294_v39 = vmul.f32 %v293_v36, %v702_v10  ;;  %v268_v59 = vadd.f32 %v267_v43, %v264_v45 }
  0x43   :  { %v287_v38 = vadd.f32 %v286_v30, %v283_v34  ;;  %s484_s16 = sld [smem:[#allocation3 + $0x3b]]  ;;  %v301_v44 = vstv %s713_s10  ;;  %v298_v49 = vmul.f32 %v297_v37, %v706_v14 }
  0x44   :  { %s733_s17 = sld [smem:[#allocation3 + $0x3c]]  ;;  %v302_v52 = vmul.f32 %v301_v44, %v718_v24  ;;  %v305_v56 = vstv %s716_s11  ;;  %v272_v7 = vadd.f32 %v271_v55, %v268_v59 }
  0x45   :  { %v291_v47 = vadd.f32 %v290_v35, %v287_v38  ;;  %s737_s18 = sld [smem:[#allocation3 + $0x3d]]  ;;  %v306_v4 = vmul.f32 %v305_v56, %v729_v42  ;;  %v309_v15 = vstv %s722_s12 }
  0x46   :  { %v313_v50 = vstv %s481_s13  ;;  %s739_s19 = sld [smem:[#allocation3 + $0x3e]]  ;;  %v275_v22 = vadd.f32 %v274_v9, %v272_v7 }
  0x47   :  { %v295_v51 = vadd.f32 %v294_v39, %v291_v47  ;;  %v314_v53 = vmul.f32 %v313_v50, %v657_v32  ;;  %v316_v54 = vstv %s482_s14  ;;  %s743_s20 = sld [smem:[#allocation3 + $0x3f]] }
  0x48   :  { %v317_v57 = vmul.f32 %v316_v54, %v665_v40  ;;  %v320_v58 = vstv %s483_s15  ;;  %s748_s21 = sld [smem:[#allocation3 + $0x4a]]  ;;  %v276_v38 = vmax.f32 %v275_v22, 0.0 }
  0x49   :  { %v299_v60 = vadd.f32 %v298_v49, %v295_v51  ;;  %v321_v61 = vmul.f32 %v320_v58, %v667_v41  ;;  %v324_v62 = vstv %s484_s16  ;;  %s490_s22 = sld [smem:[#allocation3 + $0x40]] }
  0x4a   :  { %v318_v63 = vadd.f32 %v317_v57, %v314_v53  ;;  %v325_v1 = vmul.f32 %v324_v62, %v677_v48  ;;  %v328_v2 = vstv %s733_s17  ;;  %s491_s0 = sld [smem:[#allocation3 + $0x41]] }
  0x4b   :  { %v303_v3 = vadd.f32 %v302_v52, %v299_v60  ;;  %v332_v0 = vstv %s737_s18  ;;  %s492_s23 = sld [smem:[#allocation3 + $0x42]]  ;;  %v329_v6 = vmul.f32 %v328_v2, %v702_v10 }
  0x4c   :  { %v322_v5 = vadd.f32 %v321_v61, %v318_v63  ;;  %s493_s24 = sld [smem:[#allocation3 + $0x43]]  ;;  %v336_v8 = vstv %s739_s19  ;;  %v333_v12 = vmul.f32 %v332_v0, %v706_v14 }
  0x4d   :  { %s757_s25 = sld [smem:[#allocation3 + $0x44]]  ;;  %v307_v13 = vadd.f32 %v306_v4, %v303_v3  ;;  %v340_v16 = vstv %s743_s20  ;;  %v337_v19 = vmul.f32 %v336_v8, %v718_v24 }
  0x4e   :  { %v326_v11 = vadd.f32 %v325_v1, %v322_v5  ;;  %s761_s26 = sld [smem:[#allocation3 + $0x45]]  ;;  %v341_v27 = vmul.f32 %v340_v16, %v729_v42 }
  0x4f   :  { %v348_v17 = vstv %s490_s22  ;;  %s765_s27 = sld [smem:[#allocation3 + $0x46]]  ;;  %v310_v30 = vadd.f32 %v309_v15, %v307_v13 }
  0x50   :  { %v330_v18 = vadd.f32 %v329_v6, %v326_v11  ;;  %v349_v20 = vmul.f32 %v348_v17, %v657_v32  ;;  %v351_v21 = vstv %s491_s0  ;;  %s769_s1 = sld [smem:[#allocation3 + $0x47]] }
  0x51   :  { %v352_v23 = vmul.f32 %v351_v21, %v665_v40  ;;  %v355_v25 = vstv %s492_s23  ;;  %s499_s28 = sld [smem:[#allocation3 + $0x4c]]  ;;  %v344_v40 = vstv %s748_s21  ;;  %v311_v43 = vmax.f32 %v310_v30, 0.0 }
  0x52   :  { %v334_v26 = vadd.f32 %v333_v12, %v330_v18  ;;  %v356_v28 = vmul.f32 %v355_v25, %v667_v41  ;;  %v359_v29 = vstv %s493_s24  ;;  %s500_s29 = sld [smem:[#allocation3 + $0x4d]] }
  0x53   :  { %v353_v31 = vadd.f32 %v352_v23, %v349_v20  ;;  %v360_v32 = vmul.f32 %v359_v29, %v677_v48  ;;  %v363_v33 = vstv %s757_s25  ;;  %s501_s30 = sld [smem:[#allocation3 + $0x4e]] }
  0x54   :  { %v338_v34 = vadd.f32 %v337_v19, %v334_v26  ;;  %v367_v35 = vstv %s761_s26  ;;  %v364_v37 = vmul.f32 %v363_v33, %v702_v10  ;;  %s498_s3 = sld [smem:[#allocation3 + $0x4b]] }
  0x55   :  { %v357_v36 = vadd.f32 %v356_v28, %v353_v31  ;;  %v371_v41 = vstv %s765_s27  ;;  %v368_v45 = vmul.f32 %v367_v35, %v706_v14  ;;  %s502_s4 = sld [smem:[#allocation3 + $0x4f]] }
  0x56   :  { %v342_v39 = vadd.f32 %v341_v27, %v338_v34  ;;  %v375_v46 = vstv %s769_s1  ;;  %v372_v50 = vmul.f32 %v371_v41, %v718_v24  ;;  %s503_s5 = sld [smem:[#allocation3 + $0x50]] }
  0x57   :  { %v361_v44 = vadd.f32 %v360_v32, %v357_v36  ;;  %v383_v47 = vstv %s499_s28  ;;  %v376_v52 = vmul.f32 %v375_v46, %v729_v42 }
  0x58   :  { %v345_v48 = vadd.f32 %v344_v40, %v342_v39  ;;  %v386_v51 = vstv %s500_s29  ;;  %v384_v54 = vmul.f32 %v383_v47, %v276_v38 }
  0x59   :  { %v365_v49 = vadd.f32 %v364_v37, %v361_v44  ;;  %v387_v55 = vmul.f32 %v386_v51, %v311_v43  ;;  %v390_v56 = vstv %s501_s30 }
  0x5a   :  { %v346_v53 = vmax.f32 %v345_v48, 0.0  ;;  %v379_v58 = vstv %s498_s3 }
  0x5b   :  { %v369_v10 = vadd.f32 %v368_v45, %v365_v49  ;;  %v388_v14 = vadd.f32 %v387_v55, %v384_v54  ;;  %v394_v62 = vstv %s502_s4 }
  0x5c   :  { %v391_v60 = vmul.f32 %v390_v56, %v346_v53  ;;  %v398_v2 = vstv %s503_s5 }
  0x5d   :  { %v373_v57 = vadd.f32 %v372_v50, %v369_v10 }
  0x5e   :  { %v392_v1 = vadd.f32 %v391_v60, %v388_v14 }
  0x5f   :  { %v377_v59 = vadd.f32 %v376_v52, %v373_v57 }
  0x61   :  { %v380_v61 = vadd.f32 %v379_v58, %v377_v59 }
  0x63   :  { %v381_v63 = vmax.f32 %v380_v61, 0.0 }
  0x65   :  { %v395_v24 = vmul.f32 %v394_v62, %v381_v63 }
  0x67   :  { %v396_v3 = vadd.f32 %v395_v24, %v392_v1 }
  0x69   :  { %v399_v42 = vadd.f32 %v398_v2, %v396_v3 }
  0x6b   :  { %v504_v4 = vmul.f32 -1.442695, %v399_v42 }
  0x6d   :  { %506 = vpow2.f32 %v504_v4 }
  0x73   :  { %v507_v0 = vpop.eup %506 }
  0x74   :  { %v403_v5 = vadd.f32 1.0, %v507_v0 }
  0x76   :  { %508 = vrcp.f32 %v403_v5  ;;  %v415_v8 = vand.u32 2147483648, %v403_v5  ;;  %vm409_vm0 = vweird.f32 %v403_v5  ;;  %v413_v11 = vand.u32 2147483647, %v403_v5 }
  0x78   :  { %v416_v13 = vor.u32 1.1754944e-38, %v415_v8  ;;  %vm414_vm3 = vcmp.eq.f32.partialorder %v413_v11, 8.507059e+37 }
  0x7c   :  { %v509_v6 = vpop.eup %508 }
  0x7d   :  { %v405_v7 = vmul.f32 %v509_v6, %v403_v5  ;;  %vm410_vm1 = vweird.f32 %v509_v6 }
  0x7e   :  { %vm411_vm2 = vmor %vm409_vm0, %vm410_vm1 }
  0x7f   :  { %v406_v9 = vsub.f32 1.0, %v405_v7 }
  0x81   :  { %v407_v12 = vmul.f32 %v509_v6, %v406_v9 }
  0x83   :  { %v408_v15 = vadd.f32 %v509_v6, %v407_v12 }
  0x85   :  { %v412_v16 = vsel %vm411_vm2, %v509_v6, %v408_v15 }
  0x86   :  { %v417_v17 = vsel %vm414_vm3, %v416_v13, %v412_v16 }
  0x87   :  { %419 = vst [vmem:[%s789_s2] sm:$0x1] %v417_v17 }

</bundles_post_ra>
